<compile_context>
chip_gen: v7x
topology: tpu7x:2x2x1
jax: 0.10.0
libtpu: 0.0.40
codegen_flags: <defaults>
</compile_context>

<pallas_src>
import jax
import jax.numpy as jnp
from jax.experimental import pallas as pl
from jax.experimental.pallas import tpu as pltpu

# --- model hyperparameters (consistent with the module's __init__) ---
INPUT_DIM = 8
H1 = 12
H2 = 8
NUM_ACTIONS = 4
SUPPORT_SIZE = 16
OUT_DIM = NUM_ACTIONS * SUPPORT_SIZE
V_MIN = -10.0
V_MAX = 10.0
BATCH = 2


def c51_kernel(x_ref, w1_ref, b1_ref, w2_ref, b2_ref, w3_ref, b3_ref,
               segmat_ref, wq_ref, p_ref, q_ref):
    """Forward for one batch tile.

    x_ref      : (TB, INPUT_DIM)
    w1/b1      : (INPUT_DIM, H1) / (1, H1)
    w2/b2      : (H1, H2)        / (1, H2)
    w3/b3      : (H2, OUT_DIM)   / (1, OUT_DIM)
    segmat_ref : (OUT_DIM, OUT_DIM) block-diagonal ones (segment-sum matrix)
    wq_ref     : (OUT_DIM, NUM_ACTIONS) support vector scattered per action
    p_ref      : (TB, OUT_DIM)   softmax probabilities, lane-dense
    q_ref      : (TB, NUM_ACTIONS) fused Q-values = probs @ Wq
    """
    x = x_ref[...]

    h1 = jnp.dot(x, w1_ref[...], preferred_element_type=jnp.float32) + b1_ref[...]
    h1 = jnp.maximum(h1, 0.0)

    h2 = jnp.dot(h1, w2_ref[...], preferred_element_type=jnp.float32) + b2_ref[...]
    h2 = jnp.maximum(h2, 0.0)

    logits = jnp.dot(h2, w3_ref[...], preferred_element_type=jnp.float32) + b3_ref[...]
    # logits: (TB, OUT_DIM) -- one 64-lane-wide vreg row block.

    # Per-action (segment) max, computed on full vregs with iota masks
    # (no sub-vreg lane slicing, no masked partial stores).
    lane = jax.lax.broadcasted_iota(jnp.int32, logits.shape, dimension=1)
    m = jnp.zeros_like(logits)
    for a in range(NUM_ACTIONS):
        mask = (lane >= a * SUPPORT_SIZE) & (lane < (a + 1) * SUPPORT_SIZE)
        m_a = jnp.max(jnp.where(mask, logits, -jnp.inf), axis=-1, keepdims=True)
        m = jnp.where(mask, m_a, m)

    e = jnp.exp(logits - m)
    # Per-segment sum via one MXU matmul with the block-diagonal ones matrix:
    # s[b, c] = sum of e[b, :] over the segment that lane c belongs to.
    s = jnp.dot(e, segmat_ref[...], preferred_element_type=jnp.float32)
    # Exact reciprocal keeps the sum-to-1 check tight; flip approx=True if EUP
    # throughput ever matters at very large batch.
    p = e * pl.reciprocal(s)

    p_ref[...] = p                                                   # one contiguous store
    q_ref[...] = jnp.dot(p, wq_ref[...], preferred_element_type=jnp.float32)


def _pick_tile_b(batch):
    # Biggest tile that divides the batch (per-step overhead ~0.35us; VMEM use
    # is tiny for this model, so bigger is strictly better).
    for t in (512, 256, 128, 64, 32, 16, 8):
        if batch % t == 0:
            return t
    return batch  # small / ragged batch: whole batch as a single block


def _c51_forward_impl(x, params, support):
    """Returns (dist (B, A, S), q (B, A)); dist matches PyTorch forward()."""
    w1, b1, w2, b2, w3, b3 = params
    B = x.shape[0]
    tile_b = _pick_tile_b(B)
    grid = (B // tile_b,)

    # Constant matrices for the segmented softmax and the fused Q head
    # (constant-folded under jit; DMA'd once, VMEM-resident across the grid).
    ids = jnp.arange(OUT_DIM) // SUPPORT_SIZE                        # (64,) action id per lane
    seg_mat = (ids[:, None] == ids[None, :]).astype(jnp.float32)     # (64, 64) block-diag ones
    wq = (ids[:, None] == jnp.arange(NUM_ACTIONS)[None, :]).astype(jnp.float32)
    wq = wq * jnp.tile(support, NUM_ACTIONS)[:, None]                # (64, 4)

    def row_map(i):
        return (i, 0)

    def const_map(i):
        return (0, 0)

    in_specs = [
        pl.BlockSpec((tile_b, INPUT_DIM), row_map),
        pl.BlockSpec(w1.shape, const_map),
        pl.BlockSpec(b1.shape, const_map),
        pl.BlockSpec(w2.shape, const_map),
        pl.BlockSpec(b2.shape, const_map),
        pl.BlockSpec(w3.shape, const_map),
        pl.BlockSpec(b3.shape, const_map),
        pl.BlockSpec(seg_mat.shape, const_map),
        pl.BlockSpec(wq.shape, const_map),
    ]
    out_specs = (
        pl.BlockSpec((tile_b, OUT_DIM), row_map),
        pl.BlockSpec((tile_b, NUM_ACTIONS), row_map),
    )

    probs, q = pl.pallas_call(
        c51_kernel,
        grid=grid,
        out_shape=(
            jax.ShapeDtypeStruct((B, OUT_DIM), jnp.float32),
            jax.ShapeDtypeStruct((B, NUM_ACTIONS), jnp.float32),
        ),
        in_specs=in_specs,
        out_specs=out_specs,
        compiler_params=pltpu.CompilerParams(
            dimension_semantics=("parallel",)),
    )(x, w1, b1, w2, b2, w3, b3, seg_mat, wq)

    # Free reshape (no transpose) to PyTorch's (batch, num_actions, support).
    dist = probs.reshape(B, NUM_ACTIONS, SUPPORT_SIZE)
    return dist, q


# jit the wrapper so the constant matrices are folded and the reshape fuses.
c51_forward = jax.jit(_c51_forward_impl)


def get_q_values(dist, support):
    # Pure-JAX equivalent of module.get_q_values (also computed fused in-kernel).
    return jnp.sum(dist * support[None, None, :], axis=2)


def c51_reference(x, params):
    """Pure-JAX reference of the forward pass (high-precision dots)."""
    w1, b1, w2, b2, w3, b3 = params
    hp = jax.lax.Precision.HIGHEST
    h1 = jnp.maximum(jnp.dot(x, w1, precision=hp) + b1, 0.0)
    h2 = jnp.maximum(jnp.dot(h1, w2, precision=hp) + b2, 0.0)
    logits = jnp.dot(h2, w3, precision=hp) + b3
    logits = logits.reshape(-1, NUM_ACTIONS, SUPPORT_SIZE)
    return jax.nn.softmax(logits, axis=-1)


def _kaiming_uniform(key, fan_in, fan_out):
    # nn.init.kaiming_uniform_(w, nonlinearity='relu'): bound = sqrt(6 / fan_in)
    bound = (6.0 / fan_in) ** 0.5
    return jax.random.uniform(key, (fan_in, fan_out), jnp.float32, -bound, bound)


def _bias_init(key, fan_in, fan_out):
    # PyTorch default Linear bias init: U(-1/sqrt(fan_in), 1/sqrt(fan_in))
    bound = 1.0 / (fan_in ** 0.5)
    return jax.random.uniform(key, (1, fan_out), jnp.float32, -bound, bound)


def init_params(key):
    ks = jax.random.split(key, 6)
    w1 = _kaiming_uniform(ks[0], INPUT_DIM, H1)
    b1 = _bias_init(ks[1], INPUT_DIM, H1)
    w2 = _kaiming_uniform(ks[2], H1, H2)
    b2 = _bias_init(ks[3], H1, H2)
    w3 = _kaiming_uniform(ks[4], H2, OUT_DIM)
    b3 = _bias_init(ks[5], H2, OUT_DIM)
    return (w1, b1, w2, b2, w3, b3)


if __name__ == "__main__":
    key = jax.random.PRNGKey(0)
    k_param, k_x1, k_x2 = jax.random.split(key, 3)

    params = init_params(k_param)
    support = jnp.linspace(V_MIN, V_MAX, SUPPORT_SIZE)

    # --- small demo batch (single full-batch block, grid=(1,)) ---
    x = jax.random.normal(k_x1, (BATCH, INPUT_DIM), jnp.float32)
    dist, q = c51_forward(x, params, support)
    dist = jax.block_until_ready(dist)
    q = jax.block_until_ready(q)

    assert dist.shape == (BATCH, NUM_ACTIONS, SUPPORT_SIZE)
    assert q.shape == (BATCH, NUM_ACTIONS)
    # probabilities sum to 1 over the support axis (exact reciprocal -> tight)
    assert bool(jnp.all(jnp.abs(jnp.sum(dist, axis=2) - 1.0) < 1e-5))
    # fused Q head consistent with reducing the returned distribution
    assert bool(jnp.allclose(q, get_q_values(dist, support), atol=1e-3, rtol=1e-3))
    # forward matches a pure-JAX reference (loose tol: MXU f32 pass differences)
    dist_ref = c51_reference(x, params)
    assert bool(jnp.allclose(dist, dist_ref, atol=1e-2, rtol=1e-2))

    # --- larger batch exercising the batch grid (512 rows tiled),
    #     weights held VMEM-resident across grid steps ---
    x_big = jax.random.normal(k_x2, (512, INPUT_DIM), jnp.float32)
    dist_b, q_b = c51_forward(x_big, params, support)
    dist_b = jax.block_until_ready(dist_b)
    assert dist_b.shape == (512, NUM_ACTIONS, SUPPORT_SIZE)
    assert bool(jnp.all(jnp.abs(jnp.sum(dist_b, axis=2) - 1.0) < 1e-5))
    assert bool(jnp.allclose(dist_b, c51_reference(x_big, params), atol=1e-2, rtol=1e-2))
    assert bool(jnp.allclose(q_b, get_q_values(dist_b, support), atol=1e-3, rtol=1e-3))

    print("KERNEL_OK")
</pallas_src>

<mosaic_0001>
module attributes {stable_mosaic.version = 11 : i64} {
  func.func @c51_kernel(%arg0: i32, %arg1: memref<2x8xf32, #tpu.memory_space<vmem>>, %arg2: memref<8x12xf32, #tpu.memory_space<vmem>>, %arg3: memref<1x12xf32, #tpu.memory_space<vmem>>, %arg4: memref<12x8xf32, #tpu.memory_space<vmem>>, %arg5: memref<1x8xf32, #tpu.memory_space<vmem>>, %arg6: memref<8x64xf32, #tpu.memory_space<vmem>>, %arg7: memref<1x64xf32, #tpu.memory_space<vmem>>, %arg8: memref<64x64xf32, #tpu.memory_space<vmem>>, %arg9: memref<64x4xf32, #tpu.memory_space<vmem>>, %arg10: memref<2x64xf32, #tpu.memory_space<vmem>>, %arg11: memref<2x4xf32, #tpu.memory_space<vmem>>) attributes {dimension_semantics = [#tpu.dimension_semantics<parallel>], iteration_bounds = array<i64: 1>, scalar_prefetch = 0 : i64, scratch_operands = 0 : i64, tpu.core_type = #tpu.core_type<tc>, window_params = [{transform_indices = @transform_0, window_bounds = array<i64: 2, 8>}, {pipeline_mode = #tpu.pipeline_mode<synchronous>, transform_indices = @transform_1, window_bounds = array<i64: 8, 12>}, {pipeline_mode = #tpu.pipeline_mode<synchronous>, transform_indices = @transform_2, window_bounds = array<i64: 1, 12>}, {pipeline_mode = #tpu.pipeline_mode<synchronous>, transform_indices = @transform_3, window_bounds = array<i64: 12, 8>}, {pipeline_mode = #tpu.pipeline_mode<synchronous>, transform_indices = @transform_4, window_bounds = array<i64: 1, 8>}, {pipeline_mode = #tpu.pipeline_mode<synchronous>, transform_indices = @transform_5, window_bounds = array<i64: 8, 64>}, {pipeline_mode = #tpu.pipeline_mode<synchronous>, transform_indices = @transform_6, window_bounds = array<i64: 1, 64>}, {pipeline_mode = #tpu.pipeline_mode<synchronous>, transform_indices = @transform_7, window_bounds = array<i64: 64, 64>}, {pipeline_mode = #tpu.pipeline_mode<synchronous>, transform_indices = @transform_8, window_bounds = array<i64: 64, 4>}, {transform_indices = @transform_9, window_bounds = array<i64: 2, 64>}, {transform_indices = @transform_10, window_bounds = array<i64: 2, 4>}]} {
    %c0 = arith.constant 0 : index
    %c0_0 = arith.constant 0 : index
    %0 = vector.load %arg1[%c0, %c0_0] : memref<2x8xf32, #tpu.memory_space<vmem>>, vector<2x8xf32>
    %c0_1 = arith.constant 0 : index
    %c0_2 = arith.constant 0 : index
    %1 = vector.load %arg2[%c0_1, %c0_2] : memref<8x12xf32, #tpu.memory_space<vmem>>, vector<8x12xf32>
    %cst = arith.constant dense<0.000000e+00> : vector<2x12xf32>
    %2 = tpu.matmul %0, %1, %cst {dimension_numbers = #tpu.dot_dimension_numbers<[1], [0], [0], [1], [0, 0, 1, 1], [], []>} : vector<2x8xf32>, vector<8x12xf32>, vector<2x12xf32> -> vector<2x12xf32>
    %c0_3 = arith.constant 0 : index
    %c0_4 = arith.constant 0 : index
    %3 = vector.load %arg3[%c0_3, %c0_4] : memref<1x12xf32, #tpu.memory_space<vmem>>, vector<1x12xf32>
    %4 = vector.broadcast %3 : vector<1x12xf32> to vector<2x12xf32>
    %5 = arith.addf %2, %4 : vector<2x12xf32>
    %cst_5 = arith.constant 0.000000e+00 : f32
    %6 = vector.broadcast %cst_5 : f32 to vector<2x12xf32>
    %7 = arith.maximumf %5, %6 : vector<2x12xf32>
    %c0_6 = arith.constant 0 : index
    %c0_7 = arith.constant 0 : index
    %8 = vector.load %arg4[%c0_6, %c0_7] : memref<12x8xf32, #tpu.memory_space<vmem>>, vector<12x8xf32>
    %cst_8 = arith.constant dense<0.000000e+00> : vector<2x8xf32>
    %9 = tpu.matmul %7, %8, %cst_8 {dimension_numbers = #tpu.dot_dimension_numbers<[1], [0], [0], [1], [0, 0, 1, 1], [], []>} : vector<2x12xf32>, vector<12x8xf32>, vector<2x8xf32> -> vector<2x8xf32>
    %c0_9 = arith.constant 0 : index
    %c0_10 = arith.constant 0 : index
    %10 = vector.load %arg5[%c0_9, %c0_10] : memref<1x8xf32, #tpu.memory_space<vmem>>, vector<1x8xf32>
    %11 = vector.broadcast %10 : vector<1x8xf32> to vector<2x8xf32>
    %12 = arith.addf %9, %11 : vector<2x8xf32>
    %cst_11 = arith.constant 0.000000e+00 : f32
    %13 = vector.broadcast %cst_11 : f32 to vector<2x8xf32>
    %14 = arith.maximumf %12, %13 : vector<2x8xf32>
    %c0_12 = arith.constant 0 : index
    %c0_13 = arith.constant 0 : index
    %15 = vector.load %arg6[%c0_12, %c0_13] : memref<8x64xf32, #tpu.memory_space<vmem>>, vector<8x64xf32>
    %cst_14 = arith.constant dense<0.000000e+00> : vector<2x64xf32>
    %16 = tpu.matmul %14, %15, %cst_14 {dimension_numbers = #tpu.dot_dimension_numbers<[1], [0], [0], [1], [0, 0, 1, 1], [], []>} : vector<2x8xf32>, vector<8x64xf32>, vector<2x64xf32> -> vector<2x64xf32>
    %c0_15 = arith.constant 0 : index
    %c0_16 = arith.constant 0 : index
    %17 = vector.load %arg7[%c0_15, %c0_16] : memref<1x64xf32, #tpu.memory_space<vmem>>, vector<1x64xf32>
    %18 = vector.broadcast %17 : vector<1x64xf32> to vector<2x64xf32>
    %19 = arith.addf %16, %18 : vector<2x64xf32>
    %20 = tpu.iota {dimensions = array<i32: 1>} : vector<2x64xi32>
    %cst_17 = arith.constant 0.000000e+00 : f32
    %21 = vector.broadcast %cst_17 : f32 to vector<2x64xf32>
    %c0_i32 = arith.constant 0 : i32
    %22 = vector.broadcast %c0_i32 : i32 to vector<2x64xi32>
    %23 = arith.cmpi sge, %20, %22 : vector<2x64xi32>
    %c16_i32 = arith.constant 16 : i32
    %24 = vector.broadcast %c16_i32 : i32 to vector<2x64xi32>
    %25 = arith.cmpi slt, %20, %24 : vector<2x64xi32>
    %26 = arith.andi %23, %25 : vector<2x64xi1>
    %cst_18 = arith.constant 0xFF800000 : f32
    %27 = vector.broadcast %cst_18 : f32 to vector<2x64xf32>
    %28 = arith.select %26, %19, %27 : vector<2x64xi1>, vector<2x64xf32>
    %cst_19 = arith.constant dense<0xFF800000> : vector<2xf32>
    %29 = vector.multi_reduction <maximumf>, %28, %cst_19 [1] : vector<2x64xf32> to vector<2xf32>
    %30 = vector.shape_cast %29 : vector<2xf32> to vector<2x1xf32>
    %31 = vector.shape_cast %30 : vector<2x1xf32> to vector<2x1xf32>
    %32 = vector.broadcast %31 : vector<2x1xf32> to vector<2x64xf32>
    %33 = arith.select %26, %32, %21 : vector<2x64xi1>, vector<2x64xf32>
    %c16_i32_20 = arith.constant 16 : i32
    %34 = vector.broadcast %c16_i32_20 : i32 to vector<2x64xi32>
    %35 = arith.cmpi sge, %20, %34 : vector<2x64xi32>
    %c32_i32 = arith.constant 32 : i32
    %36 = vector.broadcast %c32_i32 : i32 to vector<2x64xi32>
    %37 = arith.cmpi slt, %20, %36 : vector<2x64xi32>
    %38 = arith.andi %35, %37 : vector<2x64xi1>
    %cst_21 = arith.constant 0xFF800000 : f32
    %39 = vector.broadcast %cst_21 : f32 to vector<2x64xf32>
    %40 = arith.select %38, %19, %39 : vector<2x64xi1>, vector<2x64xf32>
    %cst_22 = arith.constant dense<0xFF800000> : vector<2xf32>
    %41 = vector.multi_reduction <maximumf>, %40, %cst_22 [1] : vector<2x64xf32> to vector<2xf32>
    %42 = vector.shape_cast %41 : vector<2xf32> to vector<2x1xf32>
    %43 = vector.shape_cast %42 : vector<2x1xf32> to vector<2x1xf32>
    %44 = vector.broadcast %43 : vector<2x1xf32> to vector<2x64xf32>
    %45 = arith.select %38, %44, %33 : vector<2x64xi1>, vector<2x64xf32>
    %c32_i32_23 = arith.constant 32 : i32
    %46 = vector.broadcast %c32_i32_23 : i32 to vector<2x64xi32>
    %47 = arith.cmpi sge, %20, %46 : vector<2x64xi32>
    %c48_i32 = arith.constant 48 : i32
    %48 = vector.broadcast %c48_i32 : i32 to vector<2x64xi32>
    %49 = arith.cmpi slt, %20, %48 : vector<2x64xi32>
    %50 = arith.andi %47, %49 : vector<2x64xi1>
    %cst_24 = arith.constant 0xFF800000 : f32
    %51 = vector.broadcast %cst_24 : f32 to vector<2x64xf32>
    %52 = arith.select %50, %19, %51 : vector<2x64xi1>, vector<2x64xf32>
    %cst_25 = arith.constant dense<0xFF800000> : vector<2xf32>
    %53 = vector.multi_reduction <maximumf>, %52, %cst_25 [1] : vector<2x64xf32> to vector<2xf32>
    %54 = vector.shape_cast %53 : vector<2xf32> to vector<2x1xf32>
    %55 = vector.shape_cast %54 : vector<2x1xf32> to vector<2x1xf32>
    %56 = vector.broadcast %55 : vector<2x1xf32> to vector<2x64xf32>
    %57 = arith.select %50, %56, %45 : vector<2x64xi1>, vector<2x64xf32>
    %c48_i32_26 = arith.constant 48 : i32
    %58 = vector.broadcast %c48_i32_26 : i32 to vector<2x64xi32>
    %59 = arith.cmpi sge, %20, %58 : vector<2x64xi32>
    %c64_i32 = arith.constant 64 : i32
    %60 = vector.broadcast %c64_i32 : i32 to vector<2x64xi32>
    %61 = arith.cmpi slt, %20, %60 : vector<2x64xi32>
    %62 = arith.andi %59, %61 : vector<2x64xi1>
    %cst_27 = arith.constant 0xFF800000 : f32
    %63 = vector.broadcast %cst_27 : f32 to vector<2x64xf32>
    %64 = arith.select %62, %19, %63 : vector<2x64xi1>, vector<2x64xf32>
    %cst_28 = arith.constant dense<0xFF800000> : vector<2xf32>
    %65 = vector.multi_reduction <maximumf>, %64, %cst_28 [1] : vector<2x64xf32> to vector<2xf32>
    %66 = vector.shape_cast %65 : vector<2xf32> to vector<2x1xf32>
    %67 = vector.shape_cast %66 : vector<2x1xf32> to vector<2x1xf32>
    %68 = vector.broadcast %67 : vector<2x1xf32> to vector<2x64xf32>
    %69 = arith.select %62, %68, %57 : vector<2x64xi1>, vector<2x64xf32>
    %70 = arith.subf %19, %69 : vector<2x64xf32>
    %71 = math.exp %70 : vector<2x64xf32>
    %c0_29 = arith.constant 0 : index
    %c0_30 = arith.constant 0 : index
    %72 = vector.load %arg8[%c0_29, %c0_30] : memref<64x64xf32, #tpu.memory_space<vmem>>, vector<64x64xf32>
    %cst_31 = arith.constant dense<0.000000e+00> : vector<2x64xf32>
    %73 = tpu.matmul %71, %72, %cst_31 {dimension_numbers = #tpu.dot_dimension_numbers<[1], [0], [0], [1], [0, 0, 1, 1], [], []>} : vector<2x64xf32>, vector<64x64xf32>, vector<2x64xf32> -> vector<2x64xf32>
    %74 = tpu.reciprocal %73 : vector<2x64xf32> -> vector<2x64xf32>
    %75 = arith.mulf %71, %74 : vector<2x64xf32>
    %c0_32 = arith.constant 0 : index
    %c0_33 = arith.constant 0 : index
    %76 = vector.load %arg10[%c0_32, %c0_33] : memref<2x64xf32, #tpu.memory_space<vmem>>, vector<2x64xf32>
    tpu.vector_store %arg10[%c0_32, %c0_33], %75 {strides = array<i32>} : memref<2x64xf32, #tpu.memory_space<vmem>>, vector<2x64xf32>,
    %c0_34 = arith.constant 0 : index
    %c0_35 = arith.constant 0 : index
    %77 = vector.load %arg9[%c0_34, %c0_35] : memref<64x4xf32, #tpu.memory_space<vmem>>, vector<64x4xf32>
    %cst_36 = arith.constant dense<0.000000e+00> : vector<2x4xf32>
    %78 = tpu.matmul %75, %77, %cst_36 {dimension_numbers = #tpu.dot_dimension_numbers<[1], [0], [0], [1], [0, 0, 1, 1], [], []>} : vector<2x64xf32>, vector<64x4xf32>, vector<2x4xf32> -> vector<2x4xf32>
    %c0_37 = arith.constant 0 : index
    %c0_38 = arith.constant 0 : index
    %79 = vector.load %arg11[%c0_37, %c0_38] : memref<2x4xf32, #tpu.memory_space<vmem>>, vector<2x4xf32>
    tpu.vector_store %arg11[%c0_37, %c0_38], %78 {strides = array<i32>} : memref<2x4xf32, #tpu.memory_space<vmem>>, vector<2x4xf32>,
    return
  }
  func.func @transform_0(%arg0: i32) -> (i32, i32) {
    %c0_i32 = arith.constant 0 : i32
    %c0_i32_0 = arith.constant 0 : i32
    return %arg0, %c0_i32 : i32, i32
  }
  func.func @transform_1(%arg0: i32) -> (i32, i32) {
    %c0_i32 = arith.constant 0 : i32
    %c0_i32_0 = arith.constant 0 : i32
    %c0_i32_1 = arith.constant 0 : i32
    return %c0_i32, %c0_i32_0 : i32, i32
  }
  func.func @transform_2(%arg0: i32) -> (i32, i32) {
    %c0_i32 = arith.constant 0 : i32
    %c0_i32_0 = arith.constant 0 : i32
    %c0_i32_1 = arith.constant 0 : i32
    return %c0_i32, %c0_i32_0 : i32, i32
  }
  func.func @transform_3(%arg0: i32) -> (i32, i32) {
    %c0_i32 = arith.constant 0 : i32
    %c0_i32_0 = arith.constant 0 : i32
    %c0_i32_1 = arith.constant 0 : i32
    return %c0_i32, %c0_i32_0 : i32, i32
  }
  func.func @transform_4(%arg0: i32) -> (i32, i32) {
    %c0_i32 = arith.constant 0 : i32
    %c0_i32_0 = arith.constant 0 : i32
    %c0_i32_1 = arith.constant 0 : i32
    return %c0_i32, %c0_i32_0 : i32, i32
  }
  func.func @transform_5(%arg0: i32) -> (i32, i32) {
    %c0_i32 = arith.constant 0 : i32
    %c0_i32_0 = arith.constant 0 : i32
    %c0_i32_1 = arith.constant 0 : i32
    return %c0_i32, %c0_i32_0 : i32, i32
  }
  func.func @transform_6(%arg0: i32) -> (i32, i32) {
    %c0_i32 = arith.constant 0 : i32
    %c0_i32_0 = arith.constant 0 : i32
    %c0_i32_1 = arith.constant 0 : i32
    return %c0_i32, %c0_i32_0 : i32, i32
  }
  func.func @transform_7(%arg0: i32) -> (i32, i32) {
    %c0_i32 = arith.constant 0 : i32
    %c0_i32_0 = arith.constant 0 : i32
    %c0_i32_1 = arith.constant 0 : i32
    return %c0_i32, %c0_i32_0 : i32, i32
  }
  func.func @transform_8(%arg0: i32) -> (i32, i32) {
    %c0_i32 = arith.constant 0 : i32
    %c0_i32_0 = arith.constant 0 : i32
    %c0_i32_1 = arith.constant 0 : i32
    return %c0_i32, %c0_i32_0 : i32, i32
  }
  func.func @transform_9(%arg0: i32) -> (i32, i32) {
    %c0_i32 = arith.constant 0 : i32
    %c0_i32_0 = arith.constant 0 : i32
    return %arg0, %c0_i32 : i32, i32
  }
  func.func @transform_10(%arg0: i32) -> (i32, i32) {
    %c0_i32 = arith.constant 0 : i32
    %c0_i32_0 = arith.constant 0 : i32
    return %arg0, %c0_i32 : i32, i32
  }
}

</mosaic_0001>

<bundles_post_ra>
// kernel: tile.8
= control target key start
LH: loop header
LB: loop body
LE: loop exit
PB: predicated region body
PF: predicated region fallthrough
CT: control target
= control target key end

     0   :  { %s22_s0 = inlined_call_operand.vmem [shape: f32[16], index: 0, kind: input, shape index: {}]   ;;  %s23_s1 = inlined_call_operand.vmem [shape: f32[4,16], index: 1, kind: output, shape index: {}]  }
   0x1   :  { %v4_v0 = vld [vmem:[%s22_s0] ss:$0 sm:$0xff] }
   0x2   :  { %5 = vst [vmem:[%s23_s1] sm:$0xf] %v4_v0 }

// kernel: mul.5
= control target key start
LH: loop header
LB: loop body
LE: loop exit
PB: predicated region body
PF: predicated region fallthrough
CT: control target
= control target key end

     0   :  { %vm7_vm0 = vcmask 130048   ;;  %s37_s8 = smov 16   ;;  %s38_s9 = smov 32   ;;  %vm13_vm1 = vcmask 523648   ;;  %vm19_vm2 = vcmask 392448   ;;  %vm25_vm3 = vcmask 261248   ;;  %s55_s0 = inlined_call_operand.vmem [shape: f32[4,16], index: 0, kind: input, shape index: {}]   ;;  %s56_s1 = inlined_call_operand.vmem [shape: f32[64], index: 1, kind: output, shape index: {}]  }
   0x1   :  { %v4_v0 = vld [vmem:[%s55_s0] sm:$0xf]  ;;  %s36_s0 = smov 48  }
   0x2   :  { %5 = vst [vmem:[#allocation1] sm:$0xf] %v4_v0 }
   0x9   :  { %v10_v1 = vld [vmem:[#allocation1 + $0x3] sm:$0x1]   ;;  %v22_v2 = vld [vmem:[#allocation1 + $0x1] sm:$0x1]   ;;  %v6_v3 = vld [vmem:[#allocation1] sm:$0x1]  }
   0xa   :  { %11 = vrot.lane.b32.xlu0 %v10_v1, %s36_s0  ;;  %23 = vrot.lane.b32.xlu1 %v22_v2, %s37_s8  ;;  %v16_v4 = vld [vmem:[#allocation1 + $0x2] sm:$0x1]   ;;  %8 = vst.msk [vmem:[#allocation0] sm:$0x1] %vm7_vm0, %v6_v3  }
   0xe   :  { %17 = vrot.lane.b32.xlu0 %v16_v4, %s38_s9 }
  0x7c   :  { %v12_v5 = vpop.permute.xlu0 %11   ;;  %v24_v6 = vpop.permute.xlu1 %23  }
  0x7d   :  { %14 = vst.msk [vmem:[#allocation0] sm:$0x1] %vm13_vm1, %v12_v5  }
  0x80   :  { %v18_v7 = vpop.permute.xlu0 %17  }
  0x81   :  { %20 = vst.msk [vmem:[#allocation0] sm:$0x1] %vm19_vm2, %v18_v7  }
  0x82   :  { %26 = vst.msk [vmem:[#allocation0] sm:$0x1] %vm25_vm3, %v24_v6  }
  0x89   :  { %v30_v8 = vld [vmem:[#allocation0] sm:$0x1] }
  0x8a   :  { %32 = vst [vmem:[%s56_s1] sm:$0x1] %v30_v8 }

// kernel: _c51_forward_impl.1
= control target key start
LH: loop header
LB: loop body
LE: loop exit
PB: predicated region body
PF: predicated region fallthrough
CT: control target
= control target key end

     0   :  { %vm44_vm0 = vcmask 64512   ;;  %v662_v2 = vmov 0.0   ;;  %vm663_vm1 = vmmov 0   ;;  %s858_s0 = inlined_call_operand.vmem [shape: f32[2,8], index: 0, kind: input, shape index: {}]   ;;  %s859_s1 = inlined_call_operand.vmem [shape: f32[8,12], index: 1, kind: input, shape index: {}]   ;;  %s860_s2 = inlined_call_operand.vmem [shape: f32[1,12], index: 2, kind: input, shape index: {}]   ;;  %s861_s3 = inlined_call_operand.vmem [shape: f32[12,8], index: 3, kind: input, shape index: {}]   ;;  %s862_s4 = inlined_call_operand.vmem [shape: f32[1,8], index: 4, kind: input, shape index: {}]   ;;  %s863_s5 = inlined_call_operand.vmem [shape: f32[8,64], index: 5, kind: input, shape index: {}]   ;;  %s864_s6 = inlined_call_operand.vmem [shape: f32[1,64], index: 6, kind: input, shape index: {}]   ;;  %s865_s7 = inlined_call_operand.vmem [shape: f32[64,64], index: 7, kind: input, shape index: {}]   ;;  %s866_s8 = inlined_call_operand.vmem [shape: f32[64,4], index: 8, kind: input, shape index: {}]   ;;  %s867_s9 = inlined_call_operand.vmem [shape: f32[2,64], index: 9, kind: output, shape index: {0}]   ;;  %s868_s10 = inlined_call_operand.hbm [shape: f32[2,4], index: 10, kind: output, shape index: {1}]  }
   0x1   :  { %v36_v0 = vld [vmem:[%s859_s1] sm:$0xff]  ;;  %546 = vmatprep.subr.mxu0 %v662_v2  ;;  %548 = vmatprep.mubr.msk.f32.mxu0 %vm663_vm1, %v662_v2 }
   0x2   :  { %v35_v1 = vld [vmem:[%s858_s0] sm:$0x3] }
   0x3   :  { %16 = vsyncpa [#allocation3], 0  ;;  %547 = vmatpush3.msra.mxu0 %v36_v0  ;;  %555 = vmatprep.mubr.msk.f32.mxu1 %vm663_vm1, %v662_v2  ;;  %v119_v3 = vld [vmem:[%s861_s3] sm:$0xff]  ;;  %v120_v4 = vld [vmem:[%s861_s3 + $0x8] sm:$0xf]  ;;  %vm132_vm2 = vcmask 1043456   ;;  %v288_v18 = vlaneseq }
   0x4   :  { %549 = vmatmul.mubr.msk.f32.vlgmr.msra.gmra.mrb[0].mxu0 %vm44_vm0, %v35_v1  ;;  %558 = vmatprep.subr.mxu0 %v662_v2  ;;  %v602_v5 = vpack.c.bf16 %v120_v4, %v119_v3  ;;  %v664_v6 = vmov 0.0|0.0   ;;  %vm665_vm3 = vmmov 1   ;;  %v512_v7 = vld [vmem:[%s860_s2] ss:$0 sm:$0xff]  ;;  %vm128_vm5 = vcmask 97280   ;;  %v327_v36 = vld [vmem:[%s865_s7 + $0x8] sm:$0xff] }
   0x5   :  { %560 = vmatprep.mubr.msk.f32.mxu0 %vm663_vm1, %v662_v2  ;;  %601 = vmatprep.subr.bf16.mxu1 %v664_v6  ;;  %vm603_vm4 = vmpackc.low %vm132_vm2, %vm665_vm3  ;;  %v207_v12 = vld [vmem:[%s863_s5] sm:$0xff]  ;;  %v289_v19 = vand.u32 127, %v288_v18  ;;  %vm294_vm14 = vcmask 517120   ;;  %v328_v38 = vld [vmem:[%s865_s7 + $0x10] sm:$0xff]  ;;  %s666_s28 = smov [#allocation2]   ;;  %vm492_vm2 = vcmask 25600  }
   0x6   :  { %604 = vmatpush3.bf16.msk.msra.mxu1 %vm603_vm4, %v602_v5  ;;  %559 = vmatpush3.msra.mxu0 %v207_v12  ;;  %v514_v13 = vld [vmem:[%s862_s4] ss:$0 sm:$0xff]  ;;  %v329_v39 = vld [vmem:[%s865_s7 + $0x18] sm:$0xff]  ;;  %v331_v42 = vld [vmem:[%s865_s7 + $0x28] sm:$0xff]  ;;  %s502_s29 = sshll.u32 %s666_s28, 4  ;;  %s503_s29 = int_to_ptr.vmem [resolvable:$true] %s502_s29 }
   0x7   :  { %605 = vmatprep.subr.bf16.mxu1 %v664_v6  ;;  %617 = vmatprep.subr.bf16.mxu0 %v664_v6  ;;  %vm307_vm6 = vcmp.ge.s32.totalorder %v289_v19, 32  ;;  %vm308_vm7 = vcmp.lt.s32.totalorder %v289_v19, 48  ;;  %v517_v20 = vld [vmem:[%s864_s6] ss:$0 sm:$0xff]  ;;  %vm315_vm8 = vcmp.ge.s32.totalorder %v289_v19, 48  ;;  %vm316_vm9 = vcmp.lt.s32.totalorder %v289_v19, 64  ;;  %p643_p1 = scmp.lt.s32.totalorder %s503_s29, %s503_s29 }
   0x8   :  { %vm299_vm10 = vcmp.ge.s32.totalorder %v289_v19, 16  ;;  %vm300_vm11 = vcmp.lt.s32.totalorder %v289_v19, 32  ;;  %vm756_vm12 = vmand %vm307_vm6, %vm308_vm7  ;;  %vm291_vm13 = vcmp.lt.s32.totalorder %v289_v19, 16  ;;  %v326_v35 = vld [vmem:[%s865_s7] sm:$0xff]  ;;  %v609_v40 = vpack.c.bf16 %v329_v39, %v328_v38  ;;  %v332_v44 = vld [vmem:[%s865_s7 + $0x30] sm:$0xff] }
   0x9   :  { %vm760_vm15 = vmand %vm315_vm8, %vm316_vm9  ;;  %v606_v37 = vpack.c.bf16 %v327_v36, %v326_v35  ;;  %v330_v41 = vld [vmem:[%s865_s7 + $0x20] sm:$0xff]  ;;  %v333_v45 = vld [vmem:[%s865_s7 + $0x38] sm:$0xff] }
   0xa   :  { %v612_v43 = vpack.c.bf16 %v331_v42, %v330_v41  ;;  %v615_v46 = vpack.c.bf16 %v333_v45, %v332_v44  ;;  %v411_v47 = vld [vmem:[%s866_s8] sm:$0xff]  ;;  %v412_v48 = vld [vmem:[%s866_s8 + $0x8] sm:$0xff]  ;;  %v413_v61 = vld [vmem:[%s866_s8 + $0x10] sm:$0xff] }
   0xb   :  { %v618_v49 = vpack.c.bf16 %v412_v48, %v411_v47  ;;  %v414_v62 = vld [vmem:[%s866_s8 + $0x18] sm:$0xff]  ;;  %v415_v0 = vld [vmem:[%s866_s8 + $0x20] sm:$0xff]  ;;  %v416_v1 = vld [vmem:[%s866_s8 + $0x28] sm:$0xff] }
   0xc   :  { %v621_v63 = vpack.c.bf16 %v414_v62, %v413_v61  ;;  %v417_v3 = vld [vmem:[%s866_s8 + $0x30] sm:$0xff]  ;;  %v418_v4 = vld [vmem:[%s866_s8 + $0x38] sm:$0xff]  ;;  %s638_s8 = scalar_lea.vmem %s503_s29, 32 }
   0xd   :  { %v627_v5 = vpack.c.bf16 %v418_v4, %v417_v3  ;;  %p639_p0 = scmp.ne.s32.totalorder %s503_s29, %s638_s8  ;;  %p644_p2 = scmp.lt.s32.totalorder %s638_s8, %s638_s8 }
   0xf   :  { %p645_p3 = por %p644_p2, %p643_p1 }
  0x11   :  { %p646_p4 = pnand %p645_p3, %p639_p0 }
  0xd7   :  { %v114_v8 = vpop.f32.mrb[0].mxu0 }
  0xd8   :  { %v115_v9 = vadd.f32 %v512_v7, %v114_v8  ;;  %v550_v10 = vpop.f32.mrb[1].mxu0 }
  0xda   :  { %v118_v11 = vmax.f32 %v115_v9, 0.0 }
  0xdc   :  { %556 = vmatmul.mubr.msk.f32.vlgmr.msra.gmra.mrb[0].mxu1 %vm128_vm5, %v118_v11 }
  0xdd   :  { %579 = vmatprep.mubr.msk.f32.mxu1 %vm663_vm1, %v662_v2  ;;  %607 = vmatpush3.bf16.msra.mxu1 %v606_v37 }
  0xde   :  { %608 = vmatprep.subr.bf16.mxu1 %v664_v6 }
  0xe1   :  { %610 = vmatpush3.bf16.msra.mxu1 %v609_v40 }
  0xe2   :  { %611 = vmatprep.subr.bf16.mxu1 %v664_v6 }
  0xe5   :  { %613 = vmatpush3.bf16.msra.mxu1 %v612_v43 }
  0xe6   :  { %614 = vmatprep.subr.bf16.mxu1 %v664_v6 }
  0xe9   :  { %616 = vmatpush3.bf16.msra.mxu1 %v615_v46 }
 0x1af   :  { %v202_v14 = vpop.f32.mrb[0].mxu1 }
 0x1b0   :  { %v203_v15 = vadd.f32 %v514_v13, %v202_v14  ;;  %v557_v16 = vpop.f32.mrb[1].mxu1 }
 0x1b2   :  { %v206_v17 = vmax.f32 %v203_v15, 0.0 }
 0x1b4   :  { %561 = vmatmul.mubr.msk.f32.vlgmr.msra.gmra.mrb[2].mxu0 %vm44_vm0, %v206_v17  ;;  %vm764_vm0 = vmand %vm299_vm10, %vm300_vm11 }
 0x1b5   :  { %598 = vmatprep.mubr.msk.f32.mxu0 %vm663_vm1, %v662_v2  ;;  %619 = vmatpush3.bf16.msra.mxu0 %v618_v49  ;;  %vm334_vm1 = vcmask 523264   ;;  %v624_v2 = vpack.c.bf16 %v416_v1, %v415_v0 }
 0x1b6   :  { %620 = vmatprep.subr.bf16.mxu0 %v664_v6 }
 0x1b9   :  { %622 = vmatpush3.bf16.msra.mxu0 %v621_v63 }
 0x1ba   :  { %623 = vmatprep.subr.bf16.mxu0 %v664_v6 }
 0x1bd   :  { %625 = vmatpush3.bf16.msra.mxu0 %v624_v2 }
 0x1be   :  { %626 = vmatprep.subr.bf16.mxu0 %v664_v6 }
 0x1c1   :  { %628 = vmatpush3.bf16.msra.mxu0 %v627_v5 }
 0x287   :  { %v284_v21 = vpop.f32.mrb[2].mxu0 }
 0x288   :  { %v285_v23 = vadd.f32 %v517_v20, %v284_v21  ;;  %v562_v24 = vpop.f32.mrb[3].mxu0 }
 0x28a   :  { %v310_v27 = vsel %vm756_vm12, %v285_v23, -inf  ;;  %v293_v28 = vsel %vm291_vm13, %v285_v23, -inf  ;;  %v318_v31 = vsel %vm760_vm15, %v285_v23, -inf  ;;  %v302_v32 = vsel %vm764_vm0, %v285_v23, -inf }
 0x28b   :  { %v311_v29 = vsel %vm294_vm14, %v310_v27, -inf  ;;  %v295_v30 = vsel %vm294_vm14, %v293_v28, -inf  ;;  %v319_v33 = vsel %vm294_vm14, %v318_v31, -inf  ;;  %v303_v34 = vsel %vm294_vm14, %v302_v32, -inf }
 0x28c   :  { %312 = vmax.xlane.f32.xlu1 %v311_v29  ;;  %296 = vmax.xlane.f32.xlu0 %v295_v30 }
 0x290   :  { %320 = vmax.xlane.f32.xlu1 %v319_v33  ;;  %304 = vmax.xlane.f32.xlu0 %v303_v34 }
 0x319   :  { %v313_v50 = vpop.xlane.xlu1 %312  ;;  %v297_v51 = vpop.xlane.xlu0 %296 }
 0x31a   :  { %v298_v52 = vsel %vm291_vm13, %v297_v51, 0.0 }
 0x31d   :  { %v305_v53 = vpop.xlane.xlu0 %304  ;;  %v321_v55 = vpop.xlane.xlu1 %320 }
 0x31e   :  { %v306_v54 = vsel %vm764_vm0, %v305_v53, %v298_v52 }
 0x31f   :  { %v314_v56 = vsel %vm756_vm12, %v313_v50, %v306_v54 }
 0x320   :  { %v322_v57 = vsel %vm760_vm15, %v321_v55, %v314_v56 }
 0x321   :  { %v323_v58 = vsub.f32 %v285_v23, %v322_v57 }
 0x323   :  { %v324_v59 = vmul.f32 1.442695, %v323_v58 }
 0x325   :  { %634 = vpow2.f32 %v324_v59 }
 0x32f   :  { %v635_v60 = vpop.eup %634 }
 0x330   :  { %580 = vmatmul.mubr.msk.f32.vlgmr.msra.gmra.mrb[2].mxu1 %vm334_vm1, %v635_v60 }
 0x403   :  { %v404_v7 = vpop.f32.mrb[2].mxu1 }
 0x404   :  { %636 = vrcp.f32 %v404_v7  ;;  %v581_v8 = vpop.f32.mrb[3].mxu1 }
 0x40e   :  { %v637_v9 = vpop.eup %636 }
 0x40f   :  { %v409_v10 = vmul.f32 %v637_v9, %v635_v60 }
 0x411   :  { %410 = vst.msk [vmem:[%s867_s9] sm:$0x3] %vm294_vm14, %v409_v10  ;;  %599 = vmatmul.mubr.msk.f32.vlgmr.msra.gmra.mrb[4].mxu0 %vm334_vm1, %v409_v10 }
 0x4e4   :  { %v488_v6 = vpop.f32.mrb[4].mxu0 }
 0x4e5   :  { %493 = vst.msk [vmem:[#allocation2] sm:$0x3] %vm492_vm2, %v488_v6  ;;  %v600_v11 = vpop.f32.mrb[5].mxu0 }
 0x4e6   :  { %649 = shalt.err (!%p646_p4)
}
 0x4e7   :  { %s650_s9 = scalar_lea.hbm %s868_s10, 32 }
 0x4e8   :  { %p651_p5 = scmp.ne.s32.totalorder %s868_s10, %s650_s9  ;;  %p654_p6 = scmp.lt.u32.totalorder %s650_s9, %s868_s10 }
 0x4ea   :  { %p656_p7 = pnand %p654_p6, %p651_p5 }
 0x4ec   :  { %659 = shalt.err (!%p656_p7)
}
 0x4ed   :  { %505 = dma.vmem_to_hbm [thread:$0]  %s503_s29, 32, %s868_s10, [#allocation3]  }
 0x4ee   :  { %660 = dma.done.wait [#allocation3], 32  }
 0x4ef   :  { %661 = vsyncadd [#allocation3], 4294967264 }
 0x4f0   :  { %511 = vsyncpa [#allocation3], 1 }

</bundles_post_ra>
